<compile_context>
chip_gen: v5e
topology: v5e:2x2
jax: 0.10.0
libtpu: 0.0.40
codegen_flags: <defaults>
</compile_context>

<pallas_src>
import functools

import jax
import jax.numpy as jnp
from jax.experimental import pallas as pl
from jax.experimental.pallas import tpu as pltpu


# ----------------------------- device queries ------------------------------


def _device_kind() -> str:
    try:
        return jax.devices()[0].device_kind.lower()
    except Exception:  # pragma: no cover - defensive only
        return ""


def _is_multi_tc(kind: str) -> bool:
    # v7x has 2 TensorCores per chip; v5e/v6e have 1.
    return ("v7" in kind) or ("7x" in kind)


def _has_bf16_vpu(kind: str) -> bool:
    # bf16 VALU/EUP exist on v6e/v7x; v5e (and older) lack it -> keep f32 math.
    return ("v6" in kind) or ("v7" in kind) or ("7x" in kind)


# --------------------------------- kernel ----------------------------------


def _ce_sum_kernel(logits_ref, labels_ref, loss_out_ref, loss_acc,
                   *, n_rows, ignore_index, compute_dtype):
    inner = pl.program_id(1)
    n_inner = pl.num_programs(1)

    @pl.when(inner == 0)
    def _():
        loss_acc[...] = jnp.zeros_like(loss_acc)

    x = logits_ref[...].astype(compute_dtype)              # (TM, V)
    labels = labels_ref[...]                                # (TM, 1) int32
    tm, v = x.shape

    # Numerically-stable shifted log-sum-exp.  row_max cancels in
    # (lse - label_logit), so `shifted` is reused for both pieces.
    row_max = jnp.max(x, axis=-1, keepdims=True)            # (TM, 1)
    shifted = x - row_max                                    # (TM, V) compute dtype

    # exp and the big sums always run/accumulate in f32 for precision.
    sum_exp = jnp.sum(jnp.exp(shifted.astype(jnp.float32)),
                      axis=-1, keepdims=True)                # (TM, 1) f32
    lse = jnp.log(sum_exp)                                   # (TM, 1) f32

    # Label gather: (1, V) lane iota broadcast against (TM, 1) labels -- no
    # (TM, V) int32 temporary.  The per-row sum has a single non-zero term,
    # so summing in the compute dtype is exact; upcast the (TM, 1) result.
    col_ids = jax.lax.broadcasted_iota(jnp.int32, (1, v), 1)
    picked = jnp.where(col_ids == labels, shifted, jnp.zeros((), compute_dtype))
    label_logit = jnp.sum(picked, axis=-1, keepdims=True).astype(jnp.float32)

    # Mask rows past n_rows (partial last tile / clamped duplicate tiles) and
    # rows whose label equals ignore_index (nn.CrossEntropyLoss default -100).
    # TODO(synk): labels outside [0, V) other than ignore_index are not
    # range-checked (PyTorch raises; here they contribute lse - 0).
    tile_idx = pl.program_id(0) * n_inner + inner
    row_base = tile_idx * tm
    row_ids = row_base + jax.lax.broadcasted_iota(jnp.int32, (tm, 1), 0)
    valid = (row_ids < n_rows) & (labels != ignore_index)

    # jnp.where is a select (not a multiply), so garbage rows from a partial
    # last tile cannot leak NaN/Inf into the accumulator.
    loss_acc[...] += jnp.where(valid, lse - label_logit, 0.0)

    @pl.when(inner == n_inner - 1)
    def _():
        total = jnp.sum(loss_acc[...], axis=0, keepdims=True)      # (1, 1)
        loss_out_ref[...] = total.reshape(1, 1, 1)


# ------------------------------ tile sizing --------------------------------


def _choose_row_tile(n_rows, vocab, itemsize, compute_itemsize, vmem_budget_bytes):
    """Largest row tile whose FULL in-kernel working set fits the budget.

    Per row of the tile we need:
      * 2 * V * itemsize          -- double-buffered native-dtype DMA tile,
      * ~2 * V * compute_itemsize -- live (TM, V) compute-dtype temps
                                     (shifted, select),
      * V * 4                     -- the f32 exp / upcast-before-exp temp.
    """
    pack = max(8, 32 // max(itemsize, 1))      # 8 for f32, 16 for bf16, 32 for i8
    bytes_per_row = vocab * (2 * itemsize + 2 * compute_itemsize + 4)
    max_rows = max(vmem_budget_bytes // max(bytes_per_row, 1), pack)
    row_tile = int(min(max_rows, 512))         # >=512-row tiles already ~85% HBM BW
    row_tile = max((row_tile // pack) * pack, pack)
    if n_rows <= row_tile:
        return n_rows                          # single block == full array dim
    return row_tile
    # TODO(synk): for vocabularies where even `pack` rows blow the budget, add a
    # vocab grid axis with an online log-sum-exp (most relevant on v7x 64 MiB VMEM).


# -------------------------------- wrapper -----------------------------------


def style_loss(logits, labels, style_scores=None,
               content_weight=0.7, style_weight=0.3, *,
               row_tile=None, num_parallel=None, compute_dtype=None,
               ignore_index=-100, vmem_limit_bytes=32 * 1024 * 1024):
    """Pallas equivalent of StyleLoss.forward.

    logits: (..., V) float (streamed in native dtype, e.g. bf16);
    labels: (...,) int; style_scores: optional float tensor.
    Returns a scalar f32 loss.
    """
    V = logits.shape[-1]
    logits2d = logits.reshape(-1, V)                        # no dtype cast in HBM
    N = logits2d.shape[0]
    labels2d = labels.reshape(-1, 1).astype(jnp.int32)      # (N, 1)
    itemsize = jnp.dtype(logits2d.dtype).itemsize

    kind = _device_kind()
    if num_parallel is None:
        # Only v7x has 2 TensorCores; single-TC parts should not pay for
        # duplicate clamped trailing tiles on a bandwidth-bound kernel.
        num_parallel = 2 if _is_multi_tc(kind) else 1
    if compute_dtype is None:
        # bf16 VALU math (max/sub/compare/select) on v6e/v7x halves the cost on
        # the saturating vector slots; v5e has no bf16 VPU -> keep f32.
        if logits2d.dtype == jnp.bfloat16 and _has_bf16_vpu(kind):
            compute_dtype = jnp.bfloat16
        else:
            compute_dtype = jnp.float32
    compute_dtype = jnp.dtype(compute_dtype)

    if row_tile is None:
        row_tile = _choose_row_tile(
            N, V, itemsize, compute_dtype.itemsize,
            vmem_budget_bytes=(vmem_limit_bytes * 3) // 4)  # headroom for compiler scratch

    total_tiles = pl.cdiv(N, row_tile)
    n_outer = max(1, min(num_parallel, total_tiles))        # megacore-splittable axis
    n_inner = pl.cdiv(total_tiles, n_outer)

    def tile_map(o, i):
        # Clamp so duplicate trailing steps re-read the last tile; their rows
        # are fully masked out in the kernel via row_ids < n_rows.
        return (jnp.minimum(o * n_inner + i, total_tiles - 1), 0)

    kernel = functools.partial(_ce_sum_kernel, n_rows=N,
                               ignore_index=ignore_index,
                               compute_dtype=compute_dtype)

    cost = pl.CostEstimate(
        flops=int(6 * N * V),
        transcendentals=int(N * V),
        bytes_accessed=int(N * V * itemsize + N * 4 + n_outer * 4))

    part_loss = pl.pallas_call(
        kernel,
        out_shape=jax.ShapeDtypeStruct((n_outer, 1, 1), jnp.float32),
        grid_spec=pltpu.PrefetchScalarGridSpec(
            num_scalar_prefetch=0,
            grid=(n_outer, n_inner),
            in_specs=[
                # Default double buffering; bump to pl.Buffered(3) only if a
                # trace shows exposed input-DMA gaps (small forced tiles).
                pl.BlockSpec((row_tile, V), tile_map),      # logits (native dtype)
                pl.BlockSpec((row_tile, 1), tile_map),      # labels
            ],
            out_specs=pl.BlockSpec((1, 1, 1), lambda o, i: (o, 0, 0)),
            scratch_shapes=[pltpu.VMEM((row_tile, 1), jnp.float32)],
        ),
        compiler_params=pltpu.CompilerParams(
            dimension_semantics=("parallel", "arbitrary"),
            vmem_limit_bytes=int(vmem_limit_bytes)),
        cost_estimate=cost,
    )(logits2d, labels2d)

    # Valid-row count is only O(N) int work -- do it in the wrapper (labels are
    # 4*N bytes), which lets the kernel drop the second scratch/output.
    loss_sum = jnp.sum(part_loss)
    count = jnp.sum(labels2d != ignore_index).astype(jnp.float32)
    # Note: if every row is ignore_index, count == 0 and this is NaN, matching
    # PyTorch's CrossEntropyLoss behaviour for an all-ignored batch.
    content = loss_sum / count

    if style_scores is None:
        return content
    style_term = 1.0 - jnp.mean(style_scores.astype(jnp.float32))
    return content_weight * content + style_weight * style_term


# ------------------------------ reference ----------------------------------


def _reference(logits, labels, style_scores, cw=0.7, sw=0.3, ignore_index=-100):
    V = logits.shape[-1]
    lg = logits.reshape(-1, V).astype(jnp.float32)
    lb = labels.reshape(-1)
    valid = lb != ignore_index
    logp = jax.nn.log_softmax(lg, axis=-1)
    safe_lb = jnp.where(valid, lb, 0)
    picked = jnp.take_along_axis(logp, safe_lb[:, None], axis=-1)[:, 0]
    content = (-jnp.sum(jnp.where(valid, picked, 0.0))
               / jnp.sum(valid).astype(jnp.float32))
    if style_scores is None:
        return content
    return cw * content + sw * (1.0 - jnp.mean(style_scores.astype(jnp.float32)))


if __name__ == "__main__":
    key = jax.random.PRNGKey(0)
    k1, k2, k3 = jax.random.split(key, 3)

    batch, seq, vocab = 2, 8, 32
    logits = jax.random.normal(k1, (batch, seq, vocab), dtype=jnp.float32)
    labels = jax.random.randint(k2, (batch, seq), 0, vocab, dtype=jnp.int32)
    style_scores = jax.random.uniform(k3, (batch, seq), dtype=jnp.float32)

    # 1) content + style, f32, auto tile / auto num_parallel (single-block path).
    loss = jax.block_until_ready(style_loss(logits, labels, style_scores))
    ref = _reference(logits, labels, style_scores)
    assert jnp.allclose(loss, ref, atol=1e-5, rtol=1e-5), (loss, ref)

    # 2) content only.
    loss_c = jax.block_until_ready(style_loss(logits, labels, None))
    ref_c = _reference(logits, labels, None)
    assert jnp.allclose(loss_c, ref_c, atol=1e-5, rtol=1e-5), (loss_c, ref_c)

    # 3) bf16 logits streamed natively + ignore_index=-100 rows.  On v6e/v7x the
    #    in-kernel max/sub/select run in bf16 (exp + sums stay f32), so compare
    #    against the f32 reference at bf16-appropriate tolerance.
    logits_bf = logits.astype(jnp.bfloat16)
    labels_ig = labels.at[0, 0].set(-100).at[1, 3].set(-100)
    loss_b = jax.block_until_ready(style_loss(logits_bf, labels_ig, style_scores))
    ref_b = _reference(logits_bf, labels_ig, style_scores)
    assert jnp.allclose(loss_b, ref_b, atol=1e-2, rtol=1e-2), (loss_b, ref_b)

    # 4) multi-step accumulation path: small forced tile, single parallel slice.
    loss_m = jax.block_until_ready(
        style_loss(logits, labels, style_scores, row_tile=8, num_parallel=1))
    assert jnp.allclose(loss_m, ref, atol=1e-5, rtol=1e-5), (loss_m, ref)

    # 5) partial last tile + forced 2-way outer axis (N=14 not divisible by 8).
    logits_p = jax.random.normal(k1, (2, 7, vocab), dtype=jnp.float32)
    labels_p = jax.random.randint(k2, (2, 7), 0, vocab, dtype=jnp.int32)
    style_p = jax.random.uniform(k3, (2, 7), dtype=jnp.float32)
    loss_p = jax.block_until_ready(
        style_loss(logits_p, labels_p, style_p, row_tile=8, num_parallel=2))
    ref_p = _reference(logits_p, labels_p, style_p)
    assert jnp.allclose(loss_p, ref_p, atol=1e-5, rtol=1e-5), (loss_p, ref_p)

    print("KERNEL_OK")
</pallas_src>

<mosaic_0001>
module attributes {stable_mosaic.version = 11 : i64} {
  func.func @_ce_sum_kernel(%arg0: i32, %arg1: i32, %arg2: memref<16x32xf32, #tpu.memory_space<vmem>>, %arg3: memref<16x1xi32, #tpu.memory_space<vmem>>, %arg4: memref<1x1x1xf32, #tpu.memory_space<vmem>>, %arg5: memref<16x1xf32, #tpu.memory_space<vmem>>) attributes {dimension_semantics = [#tpu.dimension_semantics<parallel>, #tpu.dimension_semantics<arbitrary>], iteration_bounds = array<i64: 1, 1>, scalar_prefetch = 0 : i64, scratch_operands = 1 : i64, tpu.core_type = #tpu.core_type<tc>, window_params = [{transform_indices = @transform_0, window_bounds = array<i64: 16, 32>}, {transform_indices = @transform_1, window_bounds = array<i64: 16, 1>}, {transform_indices = @transform_2, window_bounds = array<i64: 1, 1, 1>}]} {
    %c0_i32 = arith.constant 0 : i32
    %0 = arith.cmpi eq, %arg1, %c0_i32 : i32
    %1 = arith.extui %0 : i1 to i32
    %c0_i32_0 = arith.constant 0 : i32
    %2 = arith.cmpi ne, %1, %c0_i32_0 : i32
    scf.if %2 {
      %cst_15 = arith.constant 0.000000e+00 : f32
      %41 = vector.broadcast %cst_15 : f32 to vector<16x1xf32>
      %c0_16 = arith.constant 0 : index
      %c0_17 = arith.constant 0 : index
      %42 = vector.load %arg5[%c0_16, %c0_17] : memref<16x1xf32, #tpu.memory_space<vmem>>, vector<16x1xf32>
      tpu.vector_store %arg5[%c0_16, %c0_17], %41 {strides = array<i32>} : memref<16x1xf32, #tpu.memory_space<vmem>>, vector<16x1xf32>,
    } else {
    }
    %c0 = arith.constant 0 : index
    %c0_1 = arith.constant 0 : index
    %3 = vector.load %arg2[%c0, %c0_1] : memref<16x32xf32, #tpu.memory_space<vmem>>, vector<16x32xf32>
    %c0_2 = arith.constant 0 : index
    %c0_3 = arith.constant 0 : index
    %4 = vector.load %arg3[%c0_2, %c0_3] : memref<16x1xi32, #tpu.memory_space<vmem>>, vector<16x1xi32>
    %cst = arith.constant dense<0xFF800000> : vector<16xf32>
    %5 = vector.multi_reduction <maximumf>, %3, %cst [1] : vector<16x32xf32> to vector<16xf32>
    %6 = vector.shape_cast %5 : vector<16xf32> to vector<16x1xf32>
    %7 = vector.broadcast %6 : vector<16x1xf32> to vector<16x32xf32>
    %8 = arith.subf %3, %7 : vector<16x32xf32>
    %9 = math.exp %8 : vector<16x32xf32>
    %cst_4 = arith.constant dense<0.000000e+00> : vector<16xf32>
    %10 = vector.multi_reduction <add>, %9, %cst_4 [1] : vector<16x32xf32> to vector<16xf32>
    %11 = vector.shape_cast %10 : vector<16xf32> to vector<16x1xf32>
    %12 = math.log %11 : vector<16x1xf32>
    %13 = tpu.iota {dimensions = array<i32: 1>} : vector<1x32xi32>
    %14 = vector.broadcast %13 : vector<1x32xi32> to vector<16x32xi32>
    %15 = vector.broadcast %4 : vector<16x1xi32> to vector<16x32xi32>
    %16 = arith.cmpi eq, %14, %15 : vector<16x32xi32>
    %cst_5 = arith.constant 0.000000e+00 : f32
    %17 = vector.broadcast %cst_5 : f32 to vector<16x32xf32>
    %18 = arith.select %16, %8, %17 : vector<16x32xi1>, vector<16x32xf32>
    %cst_6 = arith.constant dense<0.000000e+00> : vector<16xf32>
    %19 = vector.multi_reduction <add>, %18, %cst_6 [1] : vector<16x32xf32> to vector<16xf32>
    %20 = vector.shape_cast %19 : vector<16xf32> to vector<16x1xf32>
    %c1_i32 = arith.constant 1 : i32
    %21 = arith.muli %arg0, %c1_i32 : i32
    %22 = arith.addi %21, %arg1 : i32
    %c16_i32 = arith.constant 16 : i32
    %23 = arith.muli %22, %c16_i32 : i32
    %24 = tpu.iota {dimensions = array<i32: 0>} : vector<16x1xi32>
    %25 = vector.broadcast %23 : i32 to vector<16x1xi32>
    %26 = arith.addi %25, %24 : vector<16x1xi32>
    %c16_i32_7 = arith.constant 16 : i32
    %27 = vector.broadcast %c16_i32_7 : i32 to vector<16x1xi32>
    %28 = arith.cmpi slt, %26, %27 : vector<16x1xi32>
    %c-100_i32 = arith.constant -100 : i32
    %29 = vector.broadcast %c-100_i32 : i32 to vector<16x1xi32>
    %30 = arith.cmpi ne, %4, %29 : vector<16x1xi32>
    %31 = arith.andi %28, %30 : vector<16x1xi1>
    %c0_8 = arith.constant 0 : index
    %c0_9 = arith.constant 0 : index
    %32 = vector.load %arg5[%c0_8, %c0_9] : memref<16x1xf32, #tpu.memory_space<vmem>>, vector<16x1xf32>
    %33 = arith.subf %12, %20 : vector<16x1xf32>
    %cst_10 = arith.constant 0.000000e+00 : f32
    %34 = vector.broadcast %cst_10 : f32 to vector<16x1xf32>
    %35 = arith.select %31, %33, %34 : vector<16x1xi1>, vector<16x1xf32>
    %36 = arith.addf %32, %35 : vector<16x1xf32>
    %c0_11 = arith.constant 0 : index
    %c0_12 = arith.constant 0 : index
    %37 = vector.load %arg5[%c0_11, %c0_12] : memref<16x1xf32, #tpu.memory_space<vmem>>, vector<16x1xf32>
    tpu.vector_store %arg5[%c0_11, %c0_12], %36 {strides = array<i32>} : memref<16x1xf32, #tpu.memory_space<vmem>>, vector<16x1xf32>,
    %c0_i32_13 = arith.constant 0 : i32
    %38 = arith.cmpi eq, %arg1, %c0_i32_13 : i32
    %39 = arith.extui %38 : i1 to i32
    %c0_i32_14 = arith.constant 0 : i32
    %40 = arith.cmpi ne, %39, %c0_i32_14 : i32
    scf.if %40 {
      %c0_15 = arith.constant 0 : index
      %c0_16 = arith.constant 0 : index
      %41 = vector.load %arg5[%c0_15, %c0_16] : memref<16x1xf32, #tpu.memory_space<vmem>>, vector<16x1xf32>
      %cst_17 = arith.constant dense<0.000000e+00> : vector<1xf32>
      %42 = vector.multi_reduction <add>, %41, %cst_17 [0] : vector<16x1xf32> to vector<1xf32>
      %43 = vector.shape_cast %42 : vector<1xf32> to vector<1x1xf32>
      %44 = vector.shape_cast %43 : vector<1x1xf32> to vector<1x1x1xf32>
      %c0_18 = arith.constant 0 : index
      %c0_19 = arith.constant 0 : index
      %c0_20 = arith.constant 0 : index
      %45 = vector.load %arg4[%c0_18, %c0_19, %c0_20] : memref<1x1x1xf32, #tpu.memory_space<vmem>>, vector<1x1x1xf32>
      tpu.vector_store %arg4[%c0_18, %c0_19, %c0_20], %44 {strides = array<i32>} : memref<1x1x1xf32, #tpu.memory_space<vmem>>, vector<1x1x1xf32>,
    } else {
    }
    return
  }
  func.func @transform_0(%arg0: i32, %arg1: i32) -> (i32, i32) {
    %c1_i32 = arith.constant 1 : i32
    %0 = arith.muli %arg0, %c1_i32 : i32
    %1 = arith.addi %0, %arg1 : i32
    %c0_i32 = arith.constant 0 : i32
    %2 = arith.minsi %1, %c0_i32 : i32
    %c0_i32_0 = arith.constant 0 : i32
    %c0_i32_1 = arith.constant 0 : i32
    return %2, %c0_i32_0 : i32, i32
  }
  func.func @transform_1(%arg0: i32, %arg1: i32) -> (i32, i32) {
    %c1_i32 = arith.constant 1 : i32
    %0 = arith.muli %arg0, %c1_i32 : i32
    %1 = arith.addi %0, %arg1 : i32
    %c0_i32 = arith.constant 0 : i32
    %2 = arith.minsi %1, %c0_i32 : i32
    %c0_i32_0 = arith.constant 0 : i32
    %c0_i32_1 = arith.constant 0 : i32
    return %2, %c0_i32_0 : i32, i32
  }
  func.func @transform_2(%arg0: i32, %arg1: i32) -> (i32, i32, i32) {
    %c0_i32 = arith.constant 0 : i32
    %c0_i32_0 = arith.constant 0 : i32
    %c0_i32_1 = arith.constant 0 : i32
    return %arg0, %c0_i32, %c0_i32_0 : i32, i32, i32
  }
}

</mosaic_0001>

<bundles_post_ra>
// kernel: tpu_custom_call.1
= control target key start
LH: loop header
LB: loop body
LE: loop exit
PB: predicated region body
PF: predicated region fallthrough
CT: control target
= control target key end

     0   :  { %vm87_vm0 = vcmask 261120   ;;  %v236_v3 = vmov 0   ;;  %s281_s0 = inlined_call_operand.vmem [shape: f32[16,32], index: 0, kind: input, shape index: {}]   ;;  %s282_s1 = inlined_call_operand.vmem [shape: s32[16,1], index: 1, kind: input, shape index: {}]   ;;  %s283_s2 = inlined_call_operand.hbm [shape: f32[1,1,1], index: 2, kind: output, shape index: {}]  }
   0x1   :  { %v83_v0 = vld [vmem:[%s281_s0] sm:$0xff]  ;;  %200 = vset.pattern.permute.xlu1 %v236_v3  ;;  %201 = vset.pattern.permute.xlu0 %v236_v3 }
   0x2   :  { %v85_v1 = vld [vmem:[%s282_s1] sm:$0xff]  ;;  %v88_v2 = vsel %vm87_vm0, %v83_v0, -inf }
   0x3   :  { %7 = vsyncpa [#allocation4], 0  ;;  %89 = vmax.xlane.f32.xlu0 %v88_v2  ;;  %113 = vperm.xlu1 %200, %v85_v1   ;;  %v84_v4 = vld [vmem:[%s281_s0 + $0x8] sm:$0xff]  ;;  %v110_v7 = vlaneseq  ;;  %vm80_vm3 = vcmask 7168   ;;  %v237_v25 = vmov 0.0   ;;  %vm138_vm4 = vcmp.ne.s32.totalorder %v85_v1, 4294967196 }
   0x4   :  { %v91_v5 = vsel %vm87_vm0, %v84_v4, -inf  ;;  %v86_v6 = vld [vmem:[%s282_s1 + $0x8] sm:$0xff]  ;;  %81 = vst.msk [vmem:[#allocation2] sm:$0xff] %vm80_vm3, %v237_v25  ;;  %s238_s0 = smov [#allocation3]   ;;  %s176_s19 = sshll.u32 %s283_s2, 4  ;;  %vm167_vm6 = vcmask 0   ;;  %s177_s19 = int_to_ptr.hbm [resolvable:$true] %s176_s19 }
   0x5   :  { %v111_v8 = vand.u32 127, %v110_v7  ;;  %82 = vst.msk [vmem:[#allocation2 + $0x8] sm:$0xff] %vm80_vm3, %v237_v25  ;;  %vm139_vm5 = vcmp.ne.s32.totalorder %v86_v6, 4294967196  ;;  %s174_s1 = sshll.u32 %s238_s0, 4  ;;  %s175_s1 = int_to_ptr.vmem [resolvable:$true] %s174_s1 }
   0xb   :  { %92 = vmax.xlane.f32.xlu0 %v91_v5  ;;  %116 = vperm.xlu1 %200, %v86_v6   ;;  %v142_v31 = vld [vmem:[#allocation2] sm:$0xff] }
   0xc   :  { %v143_v38 = vld [vmem:[#allocation2 + $0x8] sm:$0xff] }
  0x75   :  { %v114_v9 = vpop.permute.xlu1 %113 }
  0x76   :  { %v90_v10 = vpop.xlane.xlu0 %89  ;;  %vm118_vm1 = vcmp.eq.s32.totalorder %v111_v8, %v114_v9 }
  0x77   :  { %v94_v11 = vsub.f32 %v83_v0, %v90_v10 }
  0x79   :  { %v96_v12 = vmul.f32 1.442695, %v94_v11  ;;  %v120_v13 = vsel %vm118_vm1, %v94_v11, 0.0 }
  0x7a   :  { %v122_v14 = vsel %vm87_vm0, %v120_v13, 0.0 }
  0x7b   :  { %202 = vpow2.f32 %v96_v12  ;;  %123 = vadd.xlane.f32.xlu0 %v122_v14 }
  0x7d   :  { %v117_v15 = vpop.permute.xlu1 %116 }
  0x7e   :  { %v93_v16 = vpop.xlane.xlu0 %92  ;;  %vm119_vm2 = vcmp.eq.s32.totalorder %v111_v8, %v117_v15 }
  0x7f   :  { %v95_v17 = vsub.f32 %v84_v4, %v93_v16 }
  0x81   :  { %v203_v18 = vpop.eup %202  ;;  %v98_v19 = vmul.f32 1.442695, %v95_v17  ;;  %v121_v20 = vsel %vm119_vm2, %v95_v17, 0.0 }
  0x82   :  { %v100_v21 = vsel %vm87_vm0, %v203_v18, 0.0  ;;  %v125_v22 = vsel %vm87_vm0, %v121_v20, 0.0 }
  0x83   :  { %204 = vpow2.f32 %v98_v19  ;;  %101 = vadd.xlane.f32.xlu2 %v100_v21  ;;  %126 = vadd.xlane.f32.xlu1 %v125_v22 }
  0x89   :  { %v205_v23 = vpop.eup %204 }
  0x8a   :  { %v103_v24 = vsel %vm87_vm0, %v205_v23, 0.0 }
  0x8b   :  { %104 = vadd.xlane.f32.xlu2 %v103_v24 }
  0xee   :  { %v124_v30 = vpop.xlane.xlu0 %123 }
  0xf6   :  { %v102_v26 = vpop.xlane.xlu2 %101  ;;  %v127_v37 = vpop.xlane.xlu1 %126 }
  0xf7   :  { %206 = vlog2.f32 %v102_v26 }
  0xfd   :  { %v207_v27 = vpop.eup %206 }
  0xfe   :  { %v107_v28 = vmul.f32 0.6931472, %v207_v27  ;;  %v105_v29 = vpop.xlane.xlu2 %104 }
  0xff   :  { %208 = vlog2.f32 %v105_v29 }
 0x100   :  { %v144_v32 = vsub.f32 %v107_v28, %v124_v30 }
 0x102   :  { %v146_v33 = vsel %vm138_vm4, %v144_v32, 0.0 }
 0x103   :  { %v148_v34 = vadd.f32 %v146_v33, %v142_v31 }
 0x105   :  { %v209_v35 = vpop.eup %208  ;;  %151 = vst.msk [vmem:[#allocation2] sm:$0xff] %vm80_vm3, %v148_v34 }
 0x106   :  { %v109_v36 = vmul.f32 0.6931472, %v209_v35 }
 0x108   :  { %v145_v39 = vsub.f32 %v109_v36, %v127_v37 }
 0x10a   :  { %v147_v40 = vsel %vm139_vm5, %v145_v39, 0.0 }
 0x10b   :  { %v149_v41 = vadd.f32 %v147_v40, %v143_v38 }
 0x10c   :  { %v156_v42 = vld [vmem:[#allocation2] sm:$0xff] }
 0x10d   :  { %152 = vst.msk [vmem:[#allocation2 + $0x8] sm:$0xff] %vm80_vm3, %v149_v41  ;;  %v158_v44 = vsel %vm80_vm3, %v156_v42, 0.0 }
 0x114   :  { %v157_v43 = vld [vmem:[#allocation2 + $0x8] sm:$0xff] }
 0x115   :  { %v159_v45 = vsel %vm80_vm3, %v157_v43, 0.0 }
 0x116   :  { %v160_v46 = vadd.f32 %v159_v45, %v158_v44 }
 0x118   :  { %v161_v47 = vrot.slane %v160_v46, 4 }
 0x11a   :  { %v162_v48 = vadd.f32 %v161_v47, %v160_v46 }
 0x11c   :  { %v163_v49 = vrot.slane %v162_v48, 2 }
 0x11e   :  { %v164_v50 = vadd.f32 %v163_v49, %v162_v48 }
 0x120   :  { %v165_v51 = vrot.slane %v164_v50, 1 }
 0x122   :  { %v166_v52 = vadd.f32 %v165_v51, %v164_v50 }
 0x124   :  { %168 = vst.msk [vmem:[#allocation3] sm:$0x1] %vm167_vm6, %v166_v52 }
 0x125   :  { %179 = dma.vmem_to_hbm [thread:$0]  %s175_s1, 16, %s177_s19, [#allocation4]  }
 0x126   :  { %234 = dma.done.wait [#allocation4], 16  }
 0x127   :  { %235 = vsyncadd [#allocation4], 4294967280 }
 0x128   :  { %184 = vsyncpa [#allocation4], 1 }

</bundles_post_ra>
